<compile_context>
chip_gen: v6e
topology: v6e:2x2x1
jax: 0.10.0
libtpu: 0.0.40
codegen_flags: <defaults>
</compile_context>

<pallas_src>
import functools

import jax
import jax.numpy as jnp
from jax.experimental import pallas as pl
from jax.experimental.pallas import tpu as pltpu

_I32_MIN = -(2 ** 31)
_I32_MAX = 2 ** 31 - 1


def _argmax_kernel(x_ref, o_ref, best_key_ref, best_idx_ref, *,
                   n_total, tn, assume_no_nan):
    """Running row-wise argmax over action (lane) tiles.

    Grid = (batch_tiles, action_tiles). best_key/best_idx VMEM scratch carries
    the running maximum (as an int32 total-order key) and its first index
    across action tiles; the result is stored on the last action tile.
    """
    k = pl.program_id(1)
    nk = pl.num_programs(1)

    # Load tile in its native dtype (bf16 DMAs at half the HBM bytes), upcast
    # on the VPU (free for this mem-bound op on v6e/v7x, required on v5e).
    x = x_ref[...]
    if x.dtype != jnp.float32:
        x = x.astype(jnp.float32)

    # Monotone f32 -> i32 total-order key (-0.0 and +0.0 both map to 0).
    bits = pltpu.bitcast(x, jnp.int32)
    key = jnp.where(bits >= 0, bits, jnp.int32(_I32_MIN) - bits)
    if not assume_no_nan:
        # torch.argmax treats NaN as the maximum value.
        key = jnp.where(x != x, jnp.int32(_I32_MAX), key)

    # Local (per-tile) column index; the global offset k*tn is added to the
    # reduced (tb, 1) result below instead of per element.
    col = jax.lax.broadcasted_iota(jnp.int32, key.shape, dimension=1)
    if n_total % tn != 0:
        # Ragged last action tile: padded lanes must never win. This mask must
        # stay AFTER the NaN override (padded lanes can hold NaN garbage).
        limit = jnp.minimum(n_total - k * tn, tn)
        key = jnp.where(col < limit, key, jnp.int32(_I32_MIN))

    tile_max = jnp.max(key, axis=1, keepdims=True)
    # First column attaining the tile max (torch tie-break: first occurrence).
    tile_arg = jnp.min(jnp.where(key == tile_max, col, jnp.int32(_I32_MAX)),
                       axis=1, keepdims=True)
    tile_arg = tile_arg + k * tn            # (tb, 1) add, hoisted out of the tile

    @pl.when(k == 0)
    def _():
        best_key_ref[...] = tile_max
        best_idx_ref[...] = tile_arg

    @pl.when(k > 0)
    def _():
        better = tile_max > best_key_ref[...]   # strict > keeps earliest index
        best_idx_ref[...] = jnp.where(better, tile_arg, best_idx_ref[...])
        best_key_ref[...] = jnp.maximum(tile_max, best_key_ref[...])

    @pl.when(k == nk - 1)
    def _():
        o_ref[...] = best_idx_ref[...]


def _round_up(x, m):
    return (x + m - 1) // m * m


def _choose_tiles(b, n, itemsize):
    """Pick (batch_tile, action_tile).

    * Prefer a single full-extent action tile (no cross-tile carry, no ragged
      mask, one reduction step); tile the action axis only when one row-block
      would exceed the per-tile element budget.
    * Budget ~1M elements (~4 MiB f32-equivalent) per input tile so the
      double-buffered input plus the f32/key/iota temporaries stay well under
      the 48 MiB scoped-VMEM limit requested in greedy() on all generations.
    * tb is a multiple of the packed sublane count (8 f32 / 16 bf16) and is
      capped so the "parallel" batch axis has >= 2 blocks when b >= 16
      (uses both v7x TensorCores; no-op on v5e/v6e).
    """
    sub = max(8, 32 // max(1, itemsize))      # packed sublane multiple
    target_elems = 1 << 20                    # ~4 MiB in f32 terms per tile

    tb_min = min(b, sub)
    if n * tb_min <= target_elems:
        tn = n                                # full extent: single action tile
    else:
        tn = max(128, (target_elems // tb_min) // 128 * 128)

    tb = max(tb_min, (target_elems // max(1, tn)) // sub * sub)
    tb = min(tb, 1024)
    if b >= 16:
        tb = min(tb, _round_up(pl.cdiv(b, 2), 8))   # >= 2 parallel blocks
    if tb >= b:
        tb = b
    return tb, tn


def greedy(log_p: jax.Array, *, assume_no_nan: bool = False,
           _tiles=None) -> jax.Array:
    """torch.argmax(log_p, dim=1) for a (batch, num_actions) array -> int32."""
    assert log_p.ndim == 2, "expected (batch, num_actions)"
    b, n = log_p.shape
    # NOTE: for genuinely tiny problems jnp.argmax would beat the pallas_call
    # fixed overhead; we always run the kernel here to exercise it.
    if _tiles is None:
        tb, tn = _choose_tiles(b, n, jnp.dtype(log_p.dtype).itemsize)
    else:
        tb, tn = _tiles                       # test hook: force small tiles
    grid = (pl.cdiv(b, tb), pl.cdiv(n, tn))   # reduction (action) axis last

    out = pl.pallas_call(
        functools.partial(_argmax_kernel, n_total=n, tn=tn,
                          assume_no_nan=assume_no_nan),
        out_shape=jax.ShapeDtypeStruct((b, 1), jnp.int32),
        grid=grid,
        in_specs=[pl.BlockSpec((tb, tn), lambda i, k: (i, k))],
        out_specs=pl.BlockSpec((tb, 1), lambda i, k: (i, 0)),
        scratch_shapes=[pltpu.VMEM((tb, 1), jnp.int32),   # running max key
                        pltpu.VMEM((tb, 1), jnp.int32)],  # running argmax
        compiler_params=pltpu.CompilerParams(
            dimension_semantics=("parallel", "arbitrary"),
            vmem_limit_bytes=48 * 1024 * 1024),
    )(log_p)
    return out[:, 0]


if __name__ == "__main__":
    key = jax.random.PRNGKey(0)

    # 1) Small shape matching the module's forward: (batch=2, num_actions=16).
    log_p = jax.random.normal(key, (2, 16), dtype=jnp.float32)
    result = greedy(log_p)
    jax.block_until_ready(result)
    expected = jnp.argmax(log_p, axis=1).astype(jnp.int32)
    assert result.shape == (2,)
    assert bool(jnp.all(result == expected)), (result, expected)

    # 2) bf16 case: single full-extent action tile, batch axis split into 2
    #    parallel blocks (keeps both v7x TensorCores busy).
    k2 = jax.random.fold_in(key, 1)
    log_p2 = jax.random.normal(k2, (24, 4500), dtype=jnp.bfloat16)
    result2 = greedy(log_p2)
    jax.block_until_ready(result2)
    expected2 = jnp.argmax(log_p2, axis=1).astype(jnp.int32)
    assert bool(jnp.all(result2 == expected2)), (result2, expected2)

    # 2b) Same inputs through the reduced-op no-NaN path.
    result2b = greedy(log_p2, assume_no_nan=True)
    jax.block_until_ready(result2b)
    assert bool(jnp.all(result2b == expected2)), (result2b, expected2)

    # 3) Multi-action-tile path with a ragged last tile and cross-tile carry
    #    (tiles forced small so the test stays tiny).
    k3 = jax.random.fold_in(key, 2)
    log_p3 = jax.random.normal(k3, (8, 300), dtype=jnp.float32)
    result3 = greedy(log_p3, _tiles=(8, 128))
    jax.block_until_ready(result3)
    expected3 = jnp.argmax(log_p3, axis=1).astype(jnp.int32)
    assert bool(jnp.all(result3 == expected3)), (result3, expected3)

    # 4) NaN handling matches torch.argmax (NaN treated as the maximum).
    x_nan = jnp.array([[0.0, 5.0, jnp.nan, 7.0],
                       [1.0, 3.0, 2.0, 3.0]], dtype=jnp.float32)
    result4 = greedy(x_nan)
    jax.block_until_ready(result4)
    assert int(result4[0]) == 2 and int(result4[1]) == 1, result4

    print("KERNEL_OK")
</pallas_src>

<mosaic_0001>
module attributes {stable_mosaic.version = 11 : i64} {
  func.func @_argmax_kernel(%arg0: i32, %arg1: i32, %arg2: memref<2x16xf32, #tpu.memory_space<vmem>>, %arg3: memref<2x1xi32, #tpu.memory_space<vmem>>, %arg4: memref<2x1xi32, #tpu.memory_space<vmem>>, %arg5: memref<2x1xi32, #tpu.memory_space<vmem>>) attributes {dimension_semantics = [#tpu.dimension_semantics<parallel>, #tpu.dimension_semantics<arbitrary>], iteration_bounds = array<i64: 1, 1>, scalar_prefetch = 0 : i64, scratch_operands = 2 : i64, tpu.core_type = #tpu.core_type<tc>, window_params = [{transform_indices = @transform_0, window_bounds = array<i64: 2, 16>}, {transform_indices = @transform_1, window_bounds = array<i64: 2, 1>}]} {
    %c0 = arith.constant 0 : index
    %c0_0 = arith.constant 0 : index
    %0 = vector.load %arg2[%c0, %c0_0] : memref<2x16xf32, #tpu.memory_space<vmem>>, vector<2x16xf32>
    %1 = tpu.bitcast %0 : vector<2x16xf32> -> vector<2x16xi32>
    %c0_i32 = arith.constant 0 : i32
    %2 = vector.broadcast %c0_i32 : i32 to vector<2x16xi32>
    %3 = arith.cmpi sge, %1, %2 : vector<2x16xi32>
    %c-2147483648_i32 = arith.constant -2147483648 : i32
    %4 = vector.broadcast %c-2147483648_i32 : i32 to vector<2x16xi32>
    %5 = arith.subi %4, %1 : vector<2x16xi32>
    %6 = arith.select %3, %1, %5 : vector<2x16xi1>, vector<2x16xi32>
    %7 = arith.cmpf one, %0, %0 : vector<2x16xf32>
    %c2147483647_i32 = arith.constant 2147483647 : i32
    %8 = vector.broadcast %c2147483647_i32 : i32 to vector<2x16xi32>
    %9 = arith.select %7, %8, %6 : vector<2x16xi1>, vector<2x16xi32>
    %10 = tpu.iota {dimensions = array<i32: 1>} : vector<2x16xi32>
    %cst = arith.constant dense<-2147483648> : vector<2xi32>
    %11 = vector.multi_reduction <maxsi>, %9, %cst [1] : vector<2x16xi32> to vector<2xi32>
    %12 = vector.shape_cast %11 : vector<2xi32> to vector<2x1xi32>
    %13 = vector.broadcast %12 : vector<2x1xi32> to vector<2x16xi32>
    %14 = arith.cmpi eq, %9, %13 : vector<2x16xi32>
    %c2147483647_i32_1 = arith.constant 2147483647 : i32
    %15 = vector.broadcast %c2147483647_i32_1 : i32 to vector<2x16xi32>
    %16 = arith.select %14, %10, %15 : vector<2x16xi1>, vector<2x16xi32>
    %cst_2 = arith.constant dense<2147483647> : vector<2xi32>
    %17 = vector.multi_reduction <minsi>, %16, %cst_2 [1] : vector<2x16xi32> to vector<2xi32>
    %18 = vector.shape_cast %17 : vector<2xi32> to vector<2x1xi32>
    %c16_i32 = arith.constant 16 : i32
    %19 = arith.muli %arg1, %c16_i32 : i32
    %20 = vector.broadcast %19 : i32 to vector<2x1xi32>
    %21 = arith.addi %18, %20 : vector<2x1xi32>
    %c0_i32_3 = arith.constant 0 : i32
    %22 = arith.cmpi eq, %arg1, %c0_i32_3 : i32
    %23 = arith.extui %22 : i1 to i32
    %c0_i32_4 = arith.constant 0 : i32
    %24 = arith.cmpi ne, %23, %c0_i32_4 : i32
    scf.if %24 {
      %c0_9 = arith.constant 0 : index
      %c0_10 = arith.constant 0 : index
      %31 = vector.load %arg4[%c0_9, %c0_10] : memref<2x1xi32, #tpu.memory_space<vmem>>, vector<2x1xi32>
      tpu.vector_store %arg4[%c0_9, %c0_10], %12 {strides = array<i32>} : memref<2x1xi32, #tpu.memory_space<vmem>>, vector<2x1xi32>,
      %c0_11 = arith.constant 0 : index
      %c0_12 = arith.constant 0 : index
      %32 = vector.load %arg5[%c0_11, %c0_12] : memref<2x1xi32, #tpu.memory_space<vmem>>, vector<2x1xi32>
      tpu.vector_store %arg5[%c0_11, %c0_12], %21 {strides = array<i32>} : memref<2x1xi32, #tpu.memory_space<vmem>>, vector<2x1xi32>,
    } else {
    }
    %c0_i32_5 = arith.constant 0 : i32
    %25 = arith.cmpi sgt, %arg1, %c0_i32_5 : i32
    %26 = arith.extui %25 : i1 to i32
    %c0_i32_6 = arith.constant 0 : i32
    %27 = arith.cmpi ne, %26, %c0_i32_6 : i32
    scf.if %27 {
      %c0_9 = arith.constant 0 : index
      %c0_10 = arith.constant 0 : index
      %31 = vector.load %arg4[%c0_9, %c0_10] : memref<2x1xi32, #tpu.memory_space<vmem>>, vector<2x1xi32>
      %32 = arith.cmpi sgt, %12, %31 : vector<2x1xi32>
      %c0_11 = arith.constant 0 : index
      %c0_12 = arith.constant 0 : index
      %33 = vector.load %arg5[%c0_11, %c0_12] : memref<2x1xi32, #tpu.memory_space<vmem>>, vector<2x1xi32>
      %34 = arith.select %32, %21, %33 : vector<2x1xi1>, vector<2x1xi32>
      %c0_13 = arith.constant 0 : index
      %c0_14 = arith.constant 0 : index
      %35 = vector.load %arg5[%c0_13, %c0_14] : memref<2x1xi32, #tpu.memory_space<vmem>>, vector<2x1xi32>
      tpu.vector_store %arg5[%c0_13, %c0_14], %34 {strides = array<i32>} : memref<2x1xi32, #tpu.memory_space<vmem>>, vector<2x1xi32>,
      %c0_15 = arith.constant 0 : index
      %c0_16 = arith.constant 0 : index
      %36 = vector.load %arg4[%c0_15, %c0_16] : memref<2x1xi32, #tpu.memory_space<vmem>>, vector<2x1xi32>
      %37 = arith.maxsi %12, %36 : vector<2x1xi32>
      %c0_17 = arith.constant 0 : index
      %c0_18 = arith.constant 0 : index
      %38 = vector.load %arg4[%c0_17, %c0_18] : memref<2x1xi32, #tpu.memory_space<vmem>>, vector<2x1xi32>
      tpu.vector_store %arg4[%c0_17, %c0_18], %37 {strides = array<i32>} : memref<2x1xi32, #tpu.memory_space<vmem>>, vector<2x1xi32>,
    } else {
    }
    %c0_i32_7 = arith.constant 0 : i32
    %28 = arith.cmpi eq, %arg1, %c0_i32_7 : i32
    %29 = arith.extui %28 : i1 to i32
    %c0_i32_8 = arith.constant 0 : i32
    %30 = arith.cmpi ne, %29, %c0_i32_8 : i32
    scf.if %30 {
      %c0_9 = arith.constant 0 : index
      %c0_10 = arith.constant 0 : index
      %31 = vector.load %arg5[%c0_9, %c0_10] : memref<2x1xi32, #tpu.memory_space<vmem>>, vector<2x1xi32>
      %c0_11 = arith.constant 0 : index
      %c0_12 = arith.constant 0 : index
      %32 = vector.load %arg3[%c0_11, %c0_12] : memref<2x1xi32, #tpu.memory_space<vmem>>, vector<2x1xi32>
      tpu.vector_store %arg3[%c0_11, %c0_12], %31 {strides = array<i32>} : memref<2x1xi32, #tpu.memory_space<vmem>>, vector<2x1xi32>,
    } else {
    }
    return
  }
  func.func @transform_0(%arg0: i32, %arg1: i32) -> (i32, i32) {
    %c0_i32 = arith.constant 0 : i32
    return %arg0, %arg1 : i32, i32
  }
  func.func @transform_1(%arg0: i32, %arg1: i32) -> (i32, i32) {
    %c0_i32 = arith.constant 0 : i32
    %c0_i32_0 = arith.constant 0 : i32
    return %arg0, %c0_i32 : i32, i32
  }
}

</mosaic_0001>

<bundles_post_ra>
// kernel: tpu_custom_call.1
= control target key start
LH: loop header
LB: loop body
LE: loop exit
PB: predicated region body
PF: predicated region fallthrough
CT: control target
= control target key end

     0   :  { %6 = vsyncpa [#allocation5], 0  ;;  %s120_s6 = smov [#allocation4]   ;;  %s141_s0 = inlined_call_operand.hbm [shape: f32[2,16], index: 0, kind: input, shape index: {}]   ;;  %s142_s1 = inlined_call_operand.vmem [shape: s32[2,1], index: 1, kind: output, shape index: {}]  }
   0x1   :  { %s13_s7 = sshll.u32 %s120_s6, 4  ;;  %s14_s7 = int_to_ptr.vmem [resolvable:$true] %s13_s7 }
   0x2   :  { %s106_s8 = scalar_lea.vmem %s14_s7, 32  ;;  %p111_p1 = scmp.lt.s32.totalorder %s14_s7, %s14_s7 }
   0x3   :  { %p107_p0 = scmp.ne.s32.totalorder %s14_s7, %s106_s8  ;;  %p112_p2 = scmp.lt.s32.totalorder %s106_s8, %s106_s8 }
   0x5   :  { %p113_p3 = por %p112_p2, %p111_p1 }
   0x7   :  { %p114_p4 = pnand %p113_p3, %p107_p0 }
   0x9   :  { %117 = shalt.err (!%p114_p4)
}
   0xa   :  { %16 = dma.hbm_to_vmem [thread:$0]  %s141_s0, 32, %s14_s7, [#allocation5]  }
   0xb   :  { %118 = dma.done.wait [#allocation5], 32  }
   0xc   :  { %119 = vsyncadd [#allocation5], 4294967264  ;;  %v20_v0 = vld [vmem:[#allocation4] sm:$0x3]  ;;  %vm29_vm2 = vcmask 123904   ;;  %v27_v12 = vlaneseq  ;;  %vm69_vm4 = vcmask 1024  }
   0xd   :  { %vm22_vm0 = vcmp.ge.s32.totalorder %v20_v0, 0  ;;  %v23_v1 = vsub.s32 2147483648, %v20_v0  ;;  %vm25_vm1 = vcmp.ne.f32.partialorder %v20_v0, %v20_v0 }
   0xe   :  { %v28_v16 = vand.u32 127, %v27_v12 }
   0xf   :  { %v24_v2 = vsel %vm22_vm0, %v20_v0, %v23_v1 }
  0x10   :  { %v26_v3 = vsel %vm25_vm1, 2147483647, %v24_v2 }
  0x11   :  { %v30_v4 = vsel %vm29_vm2, %v26_v3, 2147483648 }
  0x12   :  { %v32_v5 = vshra.s32 %v30_v4, 16  ;;  %v31_v7 = vand.u32 65535, %v30_v4 }
  0x14   :  { %v34_v6 = vcvt.s32.f32 %v32_v5  ;;  %v33_v8 = vcvt.s32.f32 %v31_v7 }
  0x16   :  { %35 = vmax.xlane.f32.xlu0 %v34_v6 }
  0x9f   :  { %v36_v9 = vpop.xlane.xlu0 %35 }
  0xa0   :  { %vm37_vm3 = vcmp.eq.f32.partialorder %v34_v6, %v36_v9  ;;  %v42_v11 = vcvt.f32.s32 %v36_v9 }
  0xa1   :  { %v38_v10 = vsel %vm37_vm3, %v33_v8, -inf }
  0xa2   :  { %39 = vmax.xlane.f32.xlu0 %v38_v10  ;;  %v43_v14 = vshll.u32 %v42_v11, 16 }
 0x12b   :  { %v40_v13 = vpop.xlane.xlu0 %39 }
 0x12c   :  { %v41_v15 = vcvt.f32.s32 %v40_v13 }
 0x12e   :  { %v44_v17 = vadd.s32 %v43_v14, %v41_v15 }
 0x130   :  { %vm45_vm5 = vcmp.eq.s32.totalorder %v26_v3, %v44_v17 }
 0x131   :  { %v46_v18 = vsel %vm45_vm5, %v28_v16, 2147483647 }
 0x132   :  { %v47_v19 = vsel %vm29_vm2, %v46_v18, 2147483647 }
 0x133   :  { %v49_v20 = vshra.s32 %v47_v19, 16  ;;  %v48_v22 = vand.u32 65535, %v47_v19 }
 0x135   :  { %v51_v21 = vcvt.s32.f32 %v49_v20  ;;  %v50_v24 = vcvt.s32.f32 %v48_v22 }
 0x137   :  { %52 = vmin.xlane.f32.xlu1 %v51_v21 }
 0x1c0   :  { %v53_v23 = vpop.xlane.xlu1 %52 }
 0x1c1   :  { %vm54_vm6 = vcmp.eq.f32.partialorder %v51_v21, %v53_v23  ;;  %v59_v26 = vcvt.f32.s32 %v53_v23 }
 0x1c2   :  { %v55_v25 = vsel %vm54_vm6, %v50_v24, inf }
 0x1c3   :  { %56 = vmin.xlane.f32.xlu1 %v55_v25  ;;  %v60_v28 = vshll.u32 %v59_v26, 16 }
 0x24c   :  { %v57_v27 = vpop.xlane.xlu1 %56 }
 0x24d   :  { %v58_v29 = vcvt.f32.s32 %v57_v27 }
 0x24f   :  { %v61_v30 = vadd.s32 %v60_v28, %v58_v29 }
 0x251   :  { %71 = vst.msk [vmem:[#allocation3] sm:$0x3] %vm69_vm4, %v61_v30 }
 0x258   :  { %v89_v31 = vld [vmem:[#allocation3] sm:$0x3] }
 0x259   :  { %91 = vst.msk [vmem:[%s142_s1] sm:$0x3] %vm69_vm4, %v89_v31 }
 0x25a   :  { %96 = vsyncpa [#allocation5], 1 }

</bundles_post_ra>
